<compile_context>
chip_gen: v7x
topology: tpu7x:2x2x1
jax: 0.10.0
libtpu: 0.0.40
codegen_flags: <defaults>
</compile_context>

<pallas_src>
import numpy as np
import jax
import jax.numpy as jnp
from jax.experimental import pallas as pl
from jax.experimental.pallas import tpu as pltpu


# ----------------------------------------------------------------------------
# Kernel
# ----------------------------------------------------------------------------
def _aa_kernel(x_ref, dh_ref, dwt_ref, o_ref):
    # x_ref  : (G, H, W)    group of unpadded images (input dtype)
    # dh_ref : (Ho, H)      f32 row-sampling Gaussian matrix (zero-pad folded in)
    # dwt_ref: (W, Wo)      bf16 transposed column-sampling Gaussian matrix
    # o_ref  : (G, Ho, Wo)
    G, H, W = x_ref.shape

    # Merge (G, H) -> G*H in the *input* dtype before the bf16 cast.
    # Layout-free when H % 8 == 0 (f32 sublane tile); otherwise Mosaic inserts a
    # relayout copy (still correct, just slower).
    x2 = x_ref[...].reshape(G * H, W).astype(jnp.bfloat16)

    # W-pass: single large-M bf16 MXU matmul with f32 accumulation.
    dwt = dwt_ref[...]                                              # bf16, resident
    t = jnp.dot(x2, dwt, preferred_element_type=jnp.float32)        # (G*H, Wo) f32

    # H-pass: per-image 2D f32 matmul written straight into the output block.
    # No broadcast of dh (G copies) and no double rounding of t through bf16.
    dh = dh_ref[...]                                                 # f32, resident
    for g in range(G):                                               # static unroll
        tg = t[g * H:(g + 1) * H, :]                                 # (H, Wo)
        og = jnp.dot(dh, tg, preferred_element_type=jnp.float32)     # (Ho, Wo)
        o_ref[g] = og.astype(o_ref.dtype)


# ----------------------------------------------------------------------------
# Static (numpy) construction of the Gaussian sampling matrices
# ----------------------------------------------------------------------------
def _gaussian_1d(scale):
    """Replicates the PyTorch __init__ kernel construction (normalized 1D factor)."""
    sigma = (1.0 / scale - 1.0) / 2.0
    kernel_size = 2 * round(sigma * 4) + 1
    ka = kernel_size // 2
    kb = ka - 1 if kernel_size % 2 == 0 else ka
    coords = np.arange(kernel_size, dtype=np.float64)
    mean = (kernel_size - 1) / 2.0
    g = np.exp(-((coords - mean) ** 2) / (2.0 * sigma ** 2))
    g = (g / g.sum()).astype(np.float32)   # outer(g, g) == PyTorch normalized 2D kernel
    # int(1/scale) mirrors the PyTorch module exactly (same Python float semantics).
    return g, kernel_size, ka, kb, int(1.0 / scale)


def _build_sampling_matrix(n_out, n_in, stride, g, ka):
    """D[o, j] = g[j - o*stride + ka]; taps falling on the zero pad are dropped."""
    k = g.shape[0]
    rows = np.arange(n_out)[:, None]
    cols = np.arange(n_in)[None, :]
    idx = cols - rows * stride + ka
    valid = (idx >= 0) & (idx < k)
    D = np.zeros((n_out, n_in), dtype=np.float32)
    D[valid] = g[idx[valid]]
    return D


# ----------------------------------------------------------------------------
# Group-size / VMEM sizing
# ----------------------------------------------------------------------------
def _roundup(a, m):
    return -(-a // m) * m


def _choose_group(bc, h, w, ho, wo, budget_bytes=12 << 20, min_steps=8, max_g=64):
    """Pick images-per-step G from the true per-step VMEM footprint while keeping
    >= min_steps grid steps (>= min_steps/2 per TensorCore on v7x megacore)."""
    in_blk = _roundup(h, 8) * _roundup(w, 128) * 4        # f32 input block
    x_bf16 = _roundup(h, 16) * _roundup(w, 128) * 2       # bf16 copy for the MXU
    t_f32 = _roundup(h, 8) * _roundup(wo, 128) * 4        # W-pass result
    out_blk = _roundup(ho, 8) * _roundup(wo, 128) * 4     # f32 output block
    per_img = 2 * in_blk + x_bf16 + t_f32 + 3 * out_blk   # double-buffered in/out + temps
    fixed = 2 * (_roundup(ho, 8) * _roundup(h, 128) * 4   # dh (f32, resident)
                 + _roundup(w, 16) * _roundup(wo, 128) * 2)  # dwt (bf16, resident)
    cap = max(1, (budget_bytes - fixed) // per_img)
    step_cap = bc // min_steps if bc >= min_steps else 1
    g = max(1, min(cap, max_g, step_cap))
    est_bytes = fixed + g * per_img
    return int(g), int(est_bytes)


# ----------------------------------------------------------------------------
# Wrapper
# ----------------------------------------------------------------------------
def anti_alias_interpolation2d(x, channels, scale):
    """Forward pass of AntiAliasInterpolation2d.  x: (B, C, H, W)."""
    if scale == 1.0:
        return x

    g, _k, ka, _kb, s = _gaussian_1d(scale)
    B, C, H, W = x.shape
    assert C == channels

    Ho = (H + s - 1) // s   # len(range(0, H, s))
    Wo = (W + s - 1) // s

    # Padding folded into the sampling matrices (built against unpadded H/W).
    dh = jnp.asarray(_build_sampling_matrix(Ho, H, s, g, ka))                 # (Ho, H) f32
    dwt = jnp.asarray(np.ascontiguousarray(_build_sampling_matrix(Wo, W, s, g, ka).T),
                      dtype=jnp.bfloat16)                                      # (W, Wo) bf16

    BC = B * C
    G, est_vmem = _choose_group(BC, H, W, Ho, Wo)
    steps = pl.cdiv(BC, G)                    # ragged last block handles non-divisor BC
    x3 = x.reshape(BC, H, W)                  # metadata-only reshape

    itemsize = jnp.dtype(x.dtype).itemsize
    cost = pl.CostEstimate(
        flops=2 * BC * (H * W * Wo + Ho * H * Wo),
        transcendentals=0,
        bytes_accessed=BC * (H * W + Ho * Wo) * itemsize + Ho * H * 4 + W * Wo * 2,
    )
    vmem_limit = int(min(32 << 20, max(8 << 20, 2 * est_vmem)))

    out = pl.pallas_call(
        _aa_kernel,
        out_shape=jax.ShapeDtypeStruct((BC, Ho, Wo), x.dtype),
        grid=(steps,),
        in_specs=[
            pl.BlockSpec((G, H, W), lambda i: (i, 0, 0)),
            pl.BlockSpec((Ho, H), lambda i: (0, 0)),    # resident across the grid
            pl.BlockSpec((W, Wo), lambda i: (0, 0)),    # resident across the grid
        ],
        out_specs=pl.BlockSpec((G, Ho, Wo), lambda i: (i, 0, 0)),
        compiler_params=pltpu.CompilerParams(
            dimension_semantics=("parallel",),
            vmem_limit_bytes=vmem_limit),
        cost_estimate=cost,
    )(x3, dh, dwt)
    return out.reshape(B, C, Ho, Wo)


# ----------------------------------------------------------------------------
# Pure-JAX reference (mirrors the PyTorch forward: pad + depthwise conv + ::s)
# ----------------------------------------------------------------------------
def _reference(x, channels, scale):
    if scale == 1.0:
        return x
    g, k, ka, kb, s = _gaussian_1d(scale)
    g = jnp.asarray(g)
    xp = jnp.pad(x, ((0, 0), (0, 0), (ka, kb), (ka, kb)))
    w2d = jnp.einsum("i,j->ij", g, g)                       # (K, K), sums to 1
    w = jnp.broadcast_to(w2d[None, None], (channels, 1, k, k))
    out = jax.lax.conv_general_dilated(
        xp, w, window_strides=(1, 1), padding="VALID",
        dimension_numbers=("NCHW", "OIHW", "NCHW"),
        feature_group_count=channels)
    return out[:, :, ::s, ::s]


if __name__ == "__main__":
    channels = 4
    scale = 0.5               # sigma=0.5, kernel_size=5, ka=kb=2, stride=2
    B, H, W = 2, 16, 16

    key = jax.random.PRNGKey(0)
    x = jax.random.normal(key, (B, channels, H, W), dtype=jnp.float32)

    out = jax.block_until_ready(anti_alias_interpolation2d(x, channels, scale))
    ref = jax.block_until_ready(_reference(x, channels, scale))
    assert out.shape == (B, channels, H // 2, W // 2), out.shape
    # bf16 MXU operands on the W-pass (f32 H-pass) -> modest tolerance vs f32 ref.
    max_err = float(jnp.max(jnp.abs(out - ref)))
    assert jnp.allclose(out, ref, rtol=2e-2, atol=2e-2), max_err

    # Ragged-grid path: BC = 17 is prime -> G = 2, grid = 9 with a partial last block.
    x2 = jax.random.normal(jax.random.PRNGKey(1), (17, 1, 16, 16), dtype=jnp.float32)
    out2 = jax.block_until_ready(anti_alias_interpolation2d(x2, 1, scale))
    ref2 = jax.block_until_ready(_reference(x2, 1, scale))
    assert out2.shape == (17, 1, 8, 8), out2.shape
    assert jnp.allclose(out2, ref2, rtol=2e-2, atol=2e-2)

    print("KERNEL_OK")
</pallas_src>

<mosaic_0001>
module attributes {stable_mosaic.version = 11 : i64} {
  func.func @_aa_kernel(%arg0: i32, %arg1: memref<1x16x16xf32, #tpu.memory_space<vmem>>, %arg2: memref<8x16xf32, #tpu.memory_space<vmem>>, %arg3: memref<16x8xbf16, #tpu.memory_space<vmem>>, %arg4: memref<1x8x8xf32, #tpu.memory_space<vmem>>) attributes {dimension_semantics = [#tpu.dimension_semantics<parallel>], iteration_bounds = array<i64: 8>, scalar_prefetch = 0 : i64, scratch_operands = 0 : i64, tpu.core_type = #tpu.core_type<tc>, window_params = [{transform_indices = @transform_0, window_bounds = array<i64: 1, 16, 16>}, {pipeline_mode = #tpu.pipeline_mode<synchronous>, transform_indices = @transform_1, window_bounds = array<i64: 8, 16>}, {pipeline_mode = #tpu.pipeline_mode<synchronous>, transform_indices = @transform_2, window_bounds = array<i64: 16, 8>}, {transform_indices = @transform_3, window_bounds = array<i64: 1, 8, 8>}]} {
    %c0 = arith.constant 0 : index
    %c0_0 = arith.constant 0 : index
    %c0_1 = arith.constant 0 : index
    %0 = vector.load %arg1[%c0, %c0_0, %c0_1] : memref<1x16x16xf32, #tpu.memory_space<vmem>>, vector<1x16x16xf32>
    %1 = vector.shape_cast %0 : vector<1x16x16xf32> to vector<16x16xf32>
    %2 = arith.truncf %1 : vector<16x16xf32> to vector<16x16xbf16>
    %c0_2 = arith.constant 0 : index
    %c0_3 = arith.constant 0 : index
    %3 = vector.load %arg3[%c0_2, %c0_3] : memref<16x8xbf16, #tpu.memory_space<vmem>>, vector<16x8xbf16>
    %cst = arith.constant dense<0.000000e+00> : vector<16x8xf32>
    %4 = tpu.matmul %2, %3, %cst {dimension_numbers = #tpu.dot_dimension_numbers<[1], [0], [0], [1], [0, 0, 1, 1], [], []>} : vector<16x16xbf16>, vector<16x8xbf16>, vector<16x8xf32> -> vector<16x8xf32>
    %c0_4 = arith.constant 0 : index
    %c0_5 = arith.constant 0 : index
    %5 = vector.load %arg2[%c0_4, %c0_5] : memref<8x16xf32, #tpu.memory_space<vmem>>, vector<8x16xf32>
    %cst_6 = arith.constant dense<0.000000e+00> : vector<8x8xf32>
    %6 = tpu.matmul %5, %4, %cst_6 {dimension_numbers = #tpu.dot_dimension_numbers<[1], [0], [0], [1], [0, 0, 1, 1], [], []>} : vector<8x16xf32>, vector<16x8xf32>, vector<8x8xf32> -> vector<8x8xf32>
    %c0_7 = arith.constant 0 : index
    %c0_8 = arith.constant 0 : index
    %c0_9 = arith.constant 0 : index
    %7 = vector.load %arg4[%c0_7, %c0_8, %c0_9] : memref<1x8x8xf32, #tpu.memory_space<vmem>>, vector<1x8x8xf32>
    %8 = vector.shape_cast %7 : vector<1x8x8xf32> to vector<8x8xf32>
    %9 = vector.shape_cast %6 : vector<8x8xf32> to vector<1x8x8xf32>
    tpu.vector_store %arg4[%c0_7, %c0_8, %c0_9], %9 {strides = array<i32>} : memref<1x8x8xf32, #tpu.memory_space<vmem>>, vector<1x8x8xf32>,
    return
  }
  func.func @transform_0(%arg0: i32) -> (i32, i32, i32) {
    %c0_i32 = arith.constant 0 : i32
    %c0_i32_0 = arith.constant 0 : i32
    %c0_i32_1 = arith.constant 0 : i32
    return %arg0, %c0_i32, %c0_i32_0 : i32, i32, i32
  }
  func.func @transform_1(%arg0: i32) -> (i32, i32) {
    %c0_i32 = arith.constant 0 : i32
    %c0_i32_0 = arith.constant 0 : i32
    %c0_i32_1 = arith.constant 0 : i32
    return %c0_i32, %c0_i32_0 : i32, i32
  }
  func.func @transform_2(%arg0: i32) -> (i32, i32) {
    %c0_i32 = arith.constant 0 : i32
    %c0_i32_0 = arith.constant 0 : i32
    %c0_i32_1 = arith.constant 0 : i32
    return %c0_i32, %c0_i32_0 : i32, i32
  }
  func.func @transform_3(%arg0: i32) -> (i32, i32, i32) {
    %c0_i32 = arith.constant 0 : i32
    %c0_i32_0 = arith.constant 0 : i32
    %c0_i32_1 = arith.constant 0 : i32
    return %arg0, %c0_i32, %c0_i32_0 : i32, i32, i32
  }
}

</mosaic_0001>

<bundles_post_ra>
// kernel: tpu_custom_call.1
= control target key start
LH: loop header
LB: loop body
LE: loop exit
PB: predicated region body
PF: predicated region fallthrough
CT: control target
= control target key end

     0   :  { %8 = vsyncpa [#allocation3], 0  ;;  %s786_s0 = inlined_call_operand.hbm [shape: f32[8,16,16], index: 0, kind: input, shape index: {}]   ;;  %s787_s1 = inlined_call_operand.vmem [shape: f32[8,16], index: 1, kind: input, shape index: {}]   ;;  %s788_s2 = inlined_call_operand.vmem [shape: bf16[16,8], index: 2, kind: input, shape index: {}]   ;;  %s789_s3 = inlined_call_operand.hbm [shape: f32[8,8,8], index: 3, kind: output, shape index: {}]  }
   0x1   :  { %10 = vsyncpa [#allocation3 + $0x1], 0 }
   0x2   :  { %11 = vsyncpa [#allocation4], 0 }
   0x3   :  { %13 = vsyncpa [#allocation4 + $0x1], 0  ;;  %s621_s12 = smov 0   ;;  %s623_s13 = smov 0  }
   0x4   :  { %s625_s14 = smov 0   ;;  %s627_s15 = smov 0  }
   0x5 LB: > { %s642_s16 = sadd.s32 4294967295, %s592_s15   ;;  %s406_s17 = sadd.s32 4294967294, %s592_s15   ;;  %s592_s15 = sphi %s627_s15, %s801_s15   ;;  %s588_s14 = sphi %s625_s14, %s800_s14   ;;  %s584_s13 = sphi %s623_s13, %s799_s13   ;;  %s580_s12 = sphi %s621_s12, %s798_s12  }
   0x6   : > { %s646_s18 = sadd.s32 1, %s592_s15   ;;  %s26_s19 = sadd.s32 1, %s588_s14 }
   0x7   : > { %s23_s20 = ssub.s32 %s592_s15, %s646_s18  ;;  %p33_p0 = scmp.ne.s32.totalorder %s588_s14, %s584_s13 }
   0x8   : > { %p24_p1 = scmp.eq.s32.totalorder %s23_s20, 0  ;;  %p34_p2 = scmp.eq.s32.totalorder %s592_s15, 0 }
   0x9   : > { %p39_p3 = scmp.ne.s32.totalorder %s584_s13, %s580_s12  ;;  %p40_p4 = scmp.eq.s32.totalorder %s642_s16, 0 }
   0xa   : > { %s658_s21 = scalar_select %p24_p1, %s588_s14, %s26_s19  }
   0xb   : > { %p660_p5 = por %p34_p2, %p33_p0  ;;  %p664_p6 = por %p40_p4, %p39_p3 }
   0xc   : > { %p105_p7 = scmp.eq.s32.totalorder %s642_s16, 7  ;;  %p111_p8 = scmp.eq.s32.totalorder %s406_s17, 7 }
   0xd   : > { %p456_p9 = scmp.lt.s32.totalorder %s592_s15, 8  ;;  %s137_s26 = sand.u32 1, %s588_s14  }
   0xe   : > { %p670_p10 = por %p105_p7, %p33_p0  ;;  %p674_p11 = por %p111_p8, %p39_p3 }
   0xf   : > { %s422_s27 = sshll.u32 %s592_s15, 8  ;;  %s409_s28 = sshll.u32 %s137_s26, 4 }
  0x10   : > { %s793_s24 = scalar_select %p670_p10, 1, 0 }
  0x11   : > { %s794_s25 = scalar_select %p674_p11, 1, 0 }
  0x12   : > { %s683_s4 = scalar_lea.hbm %s786_s0, %s422_s27  ;;  %s141_s5 = scalar_lea.vmem [#allocation2], %s409_s28 }
  0x13   : > { %s148_s6 = sshll.u32 %s141_s5, 4  ;;  %p687_p12 = pnand %p456_p9, %p660_p5  ;;  %s691_s6 = int_to_ptr.vmem [resolvable:$true] %s148_s6 }
  0x14   : > { %s693_s8 = scalar_lea.sflag [#allocation3], %s137_s26  ;;  %s496_s9 = scalar_lea.hbm %s683_s4, 256 }
  0x15   : > { %p497_p13 = scmp.ne.s32.totalorder %s683_s4, %s496_s9  ;;  %p498_p0 = pneg %p687_p12 }
  0x16   : > { %s501_s17 = scalar_lea.hbm %s786_s0, 2048  ;;  %p502_p3 = scmp.lt.u32.totalorder %s683_s4, %s786_s0 }
  0x17   : > { %p499_p1 = pnand %p498_p0, %p497_p13  ;;  %p503_p4 = scmp.lt.u32.totalorder %s501_s17, %s496_s9 }
  0x18   : > { %p505_p7 = scmp.lt.u32.totalorder %s496_s9, %s683_s4 }
  0x19   : > { %p500_p2 = pneg %p499_p1  ;;  %p504_p5 = por %p503_p4, %p502_p3 }
  0x1b   : > { %p506_p8 = por %p505_p7, %p504_p5 }
  0x1d   : > { %p507_p9 = pnand %p506_p8, %p500_p2 }
  0x1f   : > { %510 = shalt.err (!%p507_p9)
}
  0x20   : > { %s511_s22 = scalar_lea.vmem %s691_s6, 256  ;;  %s594_s26 = smov [#allocation2]  }
  0x21   : > { %p512_p13 = scmp.ne.s32.totalorder %s691_s6, %s511_s22  ;;  %s516_s27 = sshll.u32 %s594_s26, 4  ;;  %s517_s27 = int_to_ptr.vmem [resolvable:$false] %s516_s27 }
  0x22   : > { %s518_s28 = scalar_lea.vmem %s517_s27, 512  ;;  %p519_p10 = scmp.lt.s32.totalorder %s691_s6, %s517_s27 }
  0x23   : > { %p514_p1 = pnand %p512_p13, %p498_p0  ;;  %p520_p3 = scmp.lt.s32.totalorder %s518_s28, %s511_s22 }
  0x25   : > { %p515_p11 = pneg %p514_p1  ;;  %p521_p4 = por %p520_p3, %p519_p10 }
  0x27   : > { %p522_p5 = pnand %p521_p4, %p515_p11 }
  0x29   : > { %525 = shalt.err (!%p522_p5)
}
  0x2a   : > { %s595_s29 = smov 128   ;;  %s596_s30 = smov 8  }
  0x2b   : > { %451 = dma.hbm_to_vmem [thread:$0]  (!%p687_p12), %s683_s4, 256, %s691_s6, %s693_s8, %s595_s29, %s595_s29, %s596_s30  }
  0x2c   : > { %p412_p0 = scmp.ge.s32.totalorder %s592_s15, 1  ;;  %p156_p2 = scmp.lt.s32.totalorder %s592_s15, 9 }
  0x2e   : > { %p157_p7 = pnand %p412_p0, %p156_p2 }
  0x2f   : > { %s724_s5 = sand.u32 (!%p157_p7), 1, %s584_s13  }
  0x30   : > { %160 = sbr.rel (%p157_p7) target bundleno = 506 (0x1fa), region = 32  ;;  %s413_s9 = sshll.u32 (!%p157_p7), %s724_s5, 4 }
  0x31   : > { %s163_s10 = scalar_lea.sflag (!%p157_p7), [#allocation3], %s724_s5  ;;  %s166_s11 = scalar_lea.vmem (!%p157_p7), [#allocation2], %s413_s9 }
  0x37   : > { %571 = dma.done.wait (%p664_p6), %s163_s10, 256  }
  0x38   : > { %573 = vsyncadd (%p664_p6), %s163_s10, 4294967040  ;;  %v597_v0 = vmov 0.0   ;;  %vm598_vm0 = vmmov 0   ;;  %v495_v1 = vld [vmem:[%s788_s2] sm:$0xff]   ;;  %v191_v3 = vld [vmem:[%s166_s11 + $0x8] sm:$0xff]  ;;  %vm201_vm1 = vcmask 130048  }
  0x39   : > { %428 = vmatprep.subr.bf16.mxu0 %v597_v0  ;;  %430 = vmatprep.mubr.msk.bf16.mxu0 %vm598_vm0, %v597_v0  ;;  %v190_v2 = vld [vmem:[%s166_s11] sm:$0xff]  ;;  %v599_v5 = vmov 0.0|0.0   ;;  %s414_s8 = sshll.u32 %s724_s5, 3  ;;  %s419_s17 = sshll.u32 %s642_s16, 7  ;;  %vm320_vm2 = vcmask 64512  }
  0x3a   : > { %438 = vmatprep.mubr.msk.f32.mxu1 %vm598_vm0, %v597_v0  ;;  %429 = vmatpush3.bf16.msra.mxu0 %v495_v1  ;;  %v192_v4 = vpack.c.bf16 %v191_v3, %v190_v2  ;;  %v246_v11 = vld [vmem:[%s787_s1] sm:$0xff]  ;;  %s188_s19 = scalar_lea.vmem [#allocation5], %s414_s8  ;;  %s743_s27 = scalar_lea.hbm %s789_s3, %s419_s17 }
  0x3b   : > { %441 = vmatprep.subr.bf16.mxu1 %v599_v5  ;;  %s336_s20 = sshll.u32 %s188_s19, 4  ;;  %s323_s28 = scalar_lea.sflag [#allocation4], %s724_s5  ;;  %s745_s20 = int_to_ptr.vmem [resolvable:$true] %s336_s20 }
  0x3c   : > { %s526_s29 = scalar_lea.vmem %s745_s20, 128  ;;  %p796_p10 = scmp.ne.s32.totalorder %s793_s24, 0 }
  0x3d   : > { %431 = vmatmul.mubr.msk.bf16.vlgmr.msra.gmra.mrb[0].mxu0 %vm201_vm1, %v192_v4  ;;  %p527_p6 = scmp.ne.s32.totalorder %s745_s20, %s526_s29  ;;  %s600_s16 = smov [#allocation5]  }
  0x3e   : > { %s530_s30 = sshll.u32 %s600_s16, 4  ;;  %s531_s30 = int_to_ptr.vmem [resolvable:$false] %s530_s30 }
  0x3f   : > { %p528_p11 = pnand %p527_p6, %p796_p10  ;;  %s532_s9 = scalar_lea.vmem %s531_s30, 256 }
  0x40   : > { %p533_p8 = scmp.lt.s32.totalorder %s745_s20, %s531_s30  ;;  %p534_p9 = scmp.lt.s32.totalorder %s532_s9, %s526_s29 }
  0x41   : > { %p529_p12 = pneg %p528_p11 }
  0x42   : > { %p535_p13 = por %p534_p9, %p533_p8 }
  0x44   : > { %p536_p1 = pnand %p535_p13, %p529_p12 }
 0x110   : > { %v239_v6 = vpop.f32.mrb[0].mxu0 }
 0x111   : > { %v432_v7 = vpop.f32.mrb[1].mxu0 }
 0x112   : > { %v242_v8 = vpop.f32.mrb[2].mxu0 }
 0x113   : > { %v442_v9 = vpack.c.bf16 %v242_v8, %v239_v6  ;;  %v433_v10 = vpop.f32.mrb[3].mxu0 }
 0x115   : > { %443 = vmatpush3.bf16.msra.mxu1 %v442_v9 }
 0x118   : > { %439 = vmatmul.mubr.msk.f32.vlgmr.msra.gmra.mrb[0].mxu1 %vm201_vm1, %v246_v11 }
 0x1eb   : > { %v316_v12 = vpop.f32.mrb[0].mxu1 }
 0x1ec   : > { %321 = vst.msk [vmem:[%s188_s19] sm:$0xff] %vm320_vm2, %v316_v12  ;;  %v440_v13 = vpop.f32.mrb[1].mxu1 }
 0x1ed   : > { %539 = shalt.err (!%p536_p1)
}
 0x1ee   : > { %s540_s5 = scalar_lea.hbm %s743_s27, 128  ;;  %s544_s4 = scalar_lea.hbm %s789_s3, 1024 }
 0x1ef   : > { %p541_p3 = scmp.ne.s32.totalorder %s743_s27, %s540_s5  ;;  %p545_p0 = scmp.lt.u32.totalorder %s743_s27, %s789_s3 }
 0x1f0   : > { %p546_p2 = scmp.lt.u32.totalorder %s544_s4, %s540_s5  ;;  %p548_p6 = scmp.lt.u32.totalorder %s540_s5, %s743_s27 }
 0x1f1   : > { %p542_p4 = pnand %p541_p3, %p796_p10 }
 0x1f2   : > { %p547_p7 = por %p546_p2, %p545_p0 }
 0x1f3   : > { %p543_p5 = pneg %p542_p4 }
 0x1f4   : > { %p549_p11 = por %p548_p6, %p547_p7 }
 0x1f6   : > { %p550_p12 = pnand %p549_p11, %p543_p5 }
 0x1f8   : > { %553 = shalt.err (!%p550_p12)
}
 0x1f9   : > { %446 = dma.vmem_to_hbm [thread:$0]  (%p796_p10), %s745_s20, 128, %s743_s27, %s323_s28  }
 0x1fa PF: > { %p457_p8 = scmp.ge.s32.totalorder %s592_s15, 2  ;;  %s348_s7 = sand.u32 1, %s580_s12  }
 0x1fb   : > { %p797_p9 = scmp.ne.s32.totalorder %s794_s25, 0  ;;  %s349_s8 = scalar_lea.sflag [#allocation4], %s348_s7 }
 0x1fd   : > { %p453_p13 = pnand %p457_p8, %p797_p9 }
 0x1ff   : > { %575 = dma.done.wait (!%p453_p13), %s349_s8, 128  }
 0x200   : > { %577 = vsyncadd (!%p453_p13), %s349_s8, 4294967168  ;;  %p16_p1 = scmp.ge.s32.totalorder %s646_s18, 10   ;;  %s798_s12 = smov %s584_s13 }
 0x201   : > { %s799_s13 = smov %s588_s14  ;;  %s800_s14 = smov %s658_s21 }
 0x202   : > { %s801_s15 = smov %s646_s18  ;;  %18 = sbr.rel (!%p16_p1) target bundleno = 5 (0x5), region = 77 }
 0x209   :  { %354 = vsyncpa [#allocation3], 1 }
 0x20a   :  { %356 = vsyncpa [#allocation3 + $0x1], 1 }
 0x20b   :  { %357 = vsyncpa [#allocation4], 1 }
 0x20c   :  { %359 = vsyncpa [#allocation4 + $0x1], 1 }

</bundles_post_ra>
